<compile_context>
chip_gen: v7x
topology: tpu7x:2x2x1
jax: 0.10.0
libtpu: 0.0.40
codegen_flags: <defaults>
</compile_context>

<pallas_src>
import jax
import jax.numpy as jnp
from jax import lax
from jax.experimental import pallas as pl
from jax.experimental.pallas import tpu as pltpu

# Fixed by the PyTorch module.
CIN, COUT, KH, KW = 9, 8, 3, 3
H, W = 21, 27
HOUT, WOUT = H + KH - 1, W + KW - 1        # 23, 29

# Kernel layout constants.
WL = 32                                     # lane pitch per output row (>= WOUT)
PITCH = WL + KW - 1                         # 34: padded input row width (kx windows fit)
ROWS = H + 2 * (KH - 1)                     # 25 zero-halo-padded input rows
KRAW = CIN * KH * KW                        # 81 (ci, ky, kx) contraction entries
KPAD = 128                                  # 81 data + 1 ones(bias) + 46 zero rows
NFLAT = HOUT * WL                           # 736 flattened output positions
NPAD = 768                                  # lane-dense (multiple of 128)


def _convt_hswish_kernel(w_ref, x_ref, o_ref):
    # w_ref: (COUT, KPAD)  w_ref[co, ci*9+ky*3+kx] = w[ci, co, KH-1-ky, KW-1-kx]
    #                      w_ref[:, KRAW]          = bias
    # x_ref: (KPAD, NPAD)  x_ref[ci*9+ky*3+kx, y*WL+x] = padded_input[ci, y+ky, x+kx]
    #                      x_ref[KRAW, :NFLAT]     = 1.0  (bias rides here)
    # o_ref: (COUT, NPAD)
    acc = jnp.dot(w_ref[...], x_ref[...], preferred_element_type=jnp.float32)
    # v6 = v1 * clamp(v1 + 3, 0, 6) * (1/6)
    o_ref[...] = acc * jnp.clip(acc + 3.0, 0.0, 6.0) * (1.0 / 6.0)


@jax.jit
def conv_transpose_hardswish(x, w, b):
    """x: (1, CIN, H, W) f32; w: (CIN, COUT, KH, KW) (PyTorch ConvTranspose2d); b: (COUT,)."""
    # Transposed conv (stride=1, pad=0) == full correlation of the zero-halo-padded
    # input with the spatially flipped kernel.
    xp = jnp.pad(x[0], ((0, 0), (KH - 1, KH - 1), (KW - 1, PITCH - W - (KW - 1))))  # (CIN,25,34)

    # Full im2col: contraction (ci,ky,kx) on sublanes, spatial flat on lanes.
    cols = [xp[:, ky:ky + HOUT, kx:kx + WL] for ky in range(KH) for kx in range(KW)]
    xk = jnp.stack(cols, axis=1).reshape(KRAW, NFLAT)                    # (81, 736)
    xk = jnp.pad(xk, ((0, 1), (0, 0)), constant_values=1.0)              # ones row (bias)
    xk = jnp.pad(xk, ((0, KPAD - KRAW - 1), (0, NPAD - NFLAT)))          # (128, 768)

    # Spatially flipped weights as one (COUT, KPAD) matrix; bias in column KRAW.
    wf = w[:, :, ::-1, ::-1]                                             # (CIN, COUT, KH, KW)
    wk = jnp.transpose(wf, (1, 0, 2, 3)).reshape(COUT, KRAW)             # (8, 81)
    wk = jnp.pad(wk, ((0, 0), (0, KPAD - KRAW)))                         # (8, 128)
    wk = wk.at[:, KRAW].set(b)

    out = pl.pallas_call(
        _convt_hswish_kernel,
        out_shape=jax.ShapeDtypeStruct((COUT, NPAD), jnp.float32),
    )(wk, xk)

    # (COUT, NPAD) -> NCHW crop; tiny and fused into this jit.
    out = out[:, :NFLAT].reshape(COUT, HOUT, WL)[:, :, :WOUT]
    return out[None]


def _reference(x, w, b):
    """Pure-JAX reference of the full forward (for correctness check)."""
    Cout = w.shape[1]
    xp = jnp.pad(x, ((0, 0), (0, 0), (KH - 1, KH - 1), (KW - 1, KW - 1)))
    wf_oihw = jnp.transpose(w[:, :, ::-1, ::-1], (1, 0, 2, 3))  # (Cout, Cin, KH, KW)
    v1 = lax.conv_general_dilated(
        xp, wf_oihw, window_strides=(1, 1), padding="VALID",
        dimension_numbers=("NCHW", "OIHW", "NCHW"))
    v1 = v1 + b.reshape(1, Cout, 1, 1)
    v4 = jnp.clip(v1 + 3.0, 0.0, 6.0)
    return v1 * v4 / 6.0


if __name__ == "__main__":
    key = jax.random.PRNGKey(0)
    kx_, kw_, kb_ = jax.random.split(key, 3)

    x = jax.random.normal(kx_, (1, CIN, H, W), dtype=jnp.float32)

    # Deterministic parameter init (PyTorch-style uniform bound).
    bound = 1.0 / (COUT * KH * KW) ** 0.5
    w = jax.random.uniform(kw_, (CIN, COUT, KH, KW), jnp.float32, -bound, bound)
    b = jax.random.uniform(kb_, (COUT,), jnp.float32, -bound, bound)

    out = conv_transpose_hardswish(x, w, b)
    out = jax.block_until_ready(out)

    ref = _reference(x, w, b)
    assert out.shape == (1, COUT, HOUT, WOUT), out.shape
    assert jnp.allclose(out, ref, atol=1e-4, rtol=1e-4), "mismatch vs reference"

    print("KERNEL_OK")
</pallas_src>

<mosaic_0001>
module attributes {stable_mosaic.version = 11 : i64} {
  func.func @_convt_hswish_kernel(%arg0: memref<8x128xf32, #tpu.memory_space<vmem>>, %arg1: memref<128x768xf32, #tpu.memory_space<vmem>>, %arg2: memref<8x768xf32, #tpu.memory_space<vmem>>) attributes {dimension_semantics = [], scalar_prefetch = 0 : i64, scratch_operands = 0 : i64, tpu.core_type = #tpu.core_type<tc>} {
    %c0 = arith.constant 0 : index
    %c0_0 = arith.constant 0 : index
    %0 = vector.load %arg0[%c0, %c0_0] : memref<8x128xf32, #tpu.memory_space<vmem>>, vector<8x128xf32>
    %c0_1 = arith.constant 0 : index
    %c0_2 = arith.constant 0 : index
    %1 = vector.load %arg1[%c0_1, %c0_2] : memref<128x768xf32, #tpu.memory_space<vmem>>, vector<128x768xf32>
    %cst = arith.constant dense<0.000000e+00> : vector<8x768xf32>
    %2 = tpu.matmul %0, %1, %cst {dimension_numbers = #tpu.dot_dimension_numbers<[1], [0], [0], [1], [0, 0, 1, 1], [], []>} : vector<8x128xf32>, vector<128x768xf32>, vector<8x768xf32> -> vector<8x768xf32>
    %cst_3 = arith.constant 3.000000e+00 : f32
    %3 = vector.broadcast %cst_3 : f32 to vector<8x768xf32>
    %4 = arith.addf %2, %3 : vector<8x768xf32>
    %cst_4 = arith.constant 0.000000e+00 : f32
    %cst_5 = arith.constant 6.000000e+00 : f32
    %5 = vector.broadcast %cst_4 : f32 to vector<8x768xf32>
    %6 = arith.maximumf %5, %4 : vector<8x768xf32>
    %7 = vector.broadcast %cst_5 : f32 to vector<8x768xf32>
    %8 = arith.minimumf %7, %6 : vector<8x768xf32>
    %9 = arith.mulf %2, %8 : vector<8x768xf32>
    %cst_6 = arith.constant 0.166666672 : f32
    %10 = vector.broadcast %cst_6 : f32 to vector<8x768xf32>
    %11 = arith.mulf %9, %10 : vector<8x768xf32>
    %c0_7 = arith.constant 0 : index
    %c0_8 = arith.constant 0 : index
    %12 = vector.load %arg2[%c0_7, %c0_8] : memref<8x768xf32, #tpu.memory_space<vmem>>, vector<8x768xf32>
    tpu.vector_store %arg2[%c0_7, %c0_8], %11 {strides = array<i32>} : memref<8x768xf32, #tpu.memory_space<vmem>>, vector<8x768xf32>,
    return
  }
}

</mosaic_0001>

<bundles_post_ra>
// kernel: conv_transpose_hardswish.1
= control target key start
LH: loop header
LB: loop body
LE: loop exit
PB: predicated region body
PF: predicated region fallthrough
CT: control target
= control target key end

     0   :  { %v458_v3 = vmov 0.0   ;;  %s791_s1 = inlined_call_operand.vmem [shape: f32[128,768], index: 1, kind: input, shape index: {}]   ;;  %s792_s0 = inlined_call_operand.vmem [shape: f32[8,128], index: 0, kind: input, shape index: {}]   ;;  %s793_s2 = inlined_call_operand.vmem [shape: f32[8,768], index: 2, kind: output, shape index: {}]  }
   0x1   :  { %v13_v0 = vld [vmem:[%s791_s1 + $0x8] sm:$0xff]  ;;  %v19_v1 = vld [vmem:[%s791_s1 + $0x38] sm:$0xff]  ;;  %v12_v2 = vld [vmem:[%s791_s1] sm:$0xff]  ;;  %172 = vmatprep.mubr.f32.mxu0 %v458_v3  ;;  %243 = vmatprep.mubr.f32.mxu1 %v458_v3 }
   0x2   :  { %v361_v4 = vpack.c.bf16 %v19_v1, %v13_v0  ;;  %v18_v5 = vld [vmem:[%s791_s1 + $0x30] sm:$0xff]  ;;  %v25_v6 = vld [vmem:[%s791_s1 + $0x68] sm:$0xff]  ;;  %v31_v7 = vld [vmem:[%s791_s1 + $0x98] sm:$0xff] }
   0x3   :  { %v363_v8 = vpack.c.bf16 %v18_v5, %v12_v2  ;;  %v365_v9 = vpack.c.bf16 %v31_v7, %v25_v6  ;;  %v24_v10 = vld [vmem:[%s791_s1 + $0x60] sm:$0xff]  ;;  %v30_v11 = vld [vmem:[%s791_s1 + $0x90] sm:$0xff]  ;;  %v37_v12 = vld [vmem:[%s791_s1 + $0xc8] sm:$0xff] }
   0x4   :  { %362 = vmatprep.subr.bf16.mxu0 %v361_v4  ;;  %v43_v13 = vld [vmem:[%s791_s1 + $0xf8] sm:$0xff]  ;;  %v367_v14 = vpack.c.bf16 %v30_v11, %v24_v10  ;;  %v36_v16 = vld [vmem:[%s791_s1 + $0xc0] sm:$0xff]  ;;  %v42_v17 = vld [vmem:[%s791_s1 + $0xf0] sm:$0xff] }
   0x5   :  { %364 = vmatpush1.bf16.msra.mxu0 %v363_v8  ;;  %v369_v15 = vpack.c.bf16 %v43_v13, %v37_v12  ;;  %v49_v18 = vld [vmem:[%s791_s1 + $0x128] sm:$0xff]  ;;  %v55_v19 = vld [vmem:[%s791_s1 + $0x158] sm:$0xff]  ;;  %v371_v20 = vpack.c.bf16 %v42_v17, %v36_v16  ;;  %v48_v21 = vld [vmem:[%s791_s1 + $0x120] sm:$0xff] }
   0x6   :  { %366 = vmatprep.subr.bf16.mxu0 %v365_v9  ;;  %v54_v22 = vld [vmem:[%s791_s1 + $0x150] sm:$0xff]  ;;  %v373_v23 = vpack.c.bf16 %v55_v19, %v49_v18  ;;  %v61_v24 = vld [vmem:[%s791_s1 + $0x188] sm:$0xff]  ;;  %v15_v25 = vld [vmem:[%s791_s1 + $0x18] sm:$0xff] }
   0x7   :  { %v21_v26 = vld [vmem:[%s791_s1 + $0x48] sm:$0xff]  ;;  %v67_v27 = vld [vmem:[%s791_s1 + $0x1b8] sm:$0xff]  ;;  %v14_v29 = vld [vmem:[%s791_s1 + $0x10] sm:$0xff]  ;;  %v375_v33 = vpack.c.bf16 %v54_v22, %v48_v21 }
   0x8   :  { %v393_v28 = vpack.c.bf16 %v21_v26, %v15_v25  ;;  %v20_v30 = vld [vmem:[%s791_s1 + $0x40] sm:$0xff]  ;;  %v27_v34 = vld [vmem:[%s791_s1 + $0x78] sm:$0xff]  ;;  %v33_v35 = vld [vmem:[%s791_s1 + $0xa8] sm:$0xff]  ;;  %v377_v37 = vpack.c.bf16 %v67_v27, %v61_v24 }
   0x9   :  { %368 = vmatpush1.bf16.msra.mxu0 %v367_v14  ;;  %v60_v31 = vld [vmem:[%s791_s1 + $0x180] sm:$0xff]  ;;  %v395_v32 = vpack.c.bf16 %v20_v30, %v14_v29  ;;  %v26_v36 = vld [vmem:[%s791_s1 + $0x70] sm:$0xff]  ;;  %v73_v39 = vld [vmem:[%s791_s1 + $0x1e8] sm:$0xff]  ;;  %v397_v40 = vpack.c.bf16 %v33_v35, %v27_v34 }
   0xa   :  { %370 = vmatprep.subr.bf16.mxu0 %v369_v15  ;;  %394 = vmatprep.subr.bf16.mxu1 %v393_v28  ;;  %v66_v38 = vld [vmem:[%s791_s1 + $0x1b0] sm:$0xff]  ;;  %v32_v41 = vld [vmem:[%s791_s1 + $0xa0] sm:$0xff]  ;;  %v79_v42 = vld [vmem:[%s791_s1 + $0x218] sm:$0xff] }
   0xb   :  { %396 = vmatpush1.bf16.msra.mxu1 %v395_v32  ;;  %v399_v43 = vpack.c.bf16 %v32_v41, %v26_v36  ;;  %v39_v44 = vld [vmem:[%s791_s1 + $0xd8] sm:$0xff]  ;;  %v45_v45 = vld [vmem:[%s791_s1 + $0x108] sm:$0xff]  ;;  %v38_v47 = vld [vmem:[%s791_s1 + $0xd0] sm:$0xff]  ;;  %v379_v48 = vpack.c.bf16 %v66_v38, %v60_v31  ;;  %v381_v52 = vpack.c.bf16 %v79_v42, %v73_v39 }
   0xc   :  { %398 = vmatprep.subr.bf16.mxu1 %v397_v40  ;;  %v401_v46 = vpack.c.bf16 %v45_v45, %v39_v44  ;;  %v72_v49 = vld [vmem:[%s791_s1 + $0x1e0] sm:$0xff]  ;;  %v78_v50 = vld [vmem:[%s791_s1 + $0x210] sm:$0xff]  ;;  %v85_v53 = vld [vmem:[%s791_s1 + $0x248] sm:$0xff] }
   0xd   :  { %372 = vmatpush1.bf16.msra.mxu0 %v371_v20  ;;  %v44_v51 = vld [vmem:[%s791_s1 + $0x100] sm:$0xff]  ;;  %v51_v55 = vld [vmem:[%s791_s1 + $0x138] sm:$0xff]  ;;  %v57_v56 = vld [vmem:[%s791_s1 + $0x168] sm:$0xff]  ;;  %v383_v62 = vpack.c.bf16 %v78_v50, %v72_v49 }
   0xe   :  { %374 = vmatprep.subr.bf16.mxu0 %v373_v23  ;;  %v403_v54 = vpack.c.bf16 %v44_v51, %v38_v47  ;;  %v91_v57 = vld [vmem:[%s791_s1 + $0x278] sm:$0xff]  ;;  %v405_v58 = vpack.c.bf16 %v57_v56, %v51_v55  ;;  %v50_v59 = vld [vmem:[%s791_s1 + $0x130] sm:$0xff]  ;;  %v56_v60 = vld [vmem:[%s791_s1 + $0x160] sm:$0xff] }
   0xf   :  { %400 = vmatpush1.bf16.msra.mxu1 %v399_v43  ;;  %v63_v61 = vld [vmem:[%s791_s1 + $0x198] sm:$0xff]  ;;  %v69_v63 = vld [vmem:[%s791_s1 + $0x1c8] sm:$0xff]  ;;  %v385_v0 = vpack.c.bf16 %v91_v57, %v85_v53  ;;  %v84_v1 = vld [vmem:[%s791_s1 + $0x240] sm:$0xff]  ;;  %v407_v5 = vpack.c.bf16 %v56_v60, %v50_v59 }
  0x10   :  { %402 = vmatprep.subr.bf16.mxu1 %v401_v46  ;;  %v90_v2 = vld [vmem:[%s791_s1 + $0x270] sm:$0xff]  ;;  %v97_v4 = vld [vmem:[%s791_s1 + $0x2a8] sm:$0xff]  ;;  %v103_v6 = vld [vmem:[%s791_s1 + $0x2d8] sm:$0xff]  ;;  %v409_v7 = vpack.c.bf16 %v69_v63, %v63_v61 }
  0x11   :  { %376 = vmatpush1.bf16.msra.mxu0 %v375_v33  ;;  %v62_v8 = vld [vmem:[%s791_s1 + $0x190] sm:$0xff]  ;;  %v68_v9 = vld [vmem:[%s791_s1 + $0x1c0] sm:$0xff]  ;;  %v75_v10 = vld [vmem:[%s791_s1 + $0x1f8] sm:$0xff]  ;;  %v387_v12 = vpack.c.bf16 %v90_v2, %v84_v1  ;;  %v389_v13 = vpack.c.bf16 %v103_v6, %v97_v4 }
  0x12   :  { %378 = vmatprep.subr.bf16.mxu0 %v377_v37  ;;  %v81_v11 = vld [vmem:[%s791_s1 + $0x228] sm:$0xff]  ;;  %v96_v14 = vld [vmem:[%s791_s1 + $0x2a0] sm:$0xff]  ;;  %v102_v15 = vld [vmem:[%s791_s1 + $0x2d0] sm:$0xff]  ;;  %v411_v17 = vpack.c.bf16 %v68_v9, %v62_v8 }
  0x13   :  { %404 = vmatpush1.bf16.msra.mxu1 %v403_v54  ;;  %v17_v16 = vld [vmem:[%s791_s1 + $0x28] sm:$0xff]  ;;  %v23_v18 = vld [vmem:[%s791_s1 + $0x58] sm:$0xff]  ;;  %v413_v19 = vpack.c.bf16 %v81_v11, %v75_v10  ;;  %v74_v20 = vld [vmem:[%s791_s1 + $0x1f0] sm:$0xff]  ;;  %v391_v24 = vpack.c.bf16 %v102_v15, %v96_v14 }
  0x14   :  { %406 = vmatprep.subr.bf16.mxu1 %v405_v58  ;;  %v80_v21 = vld [vmem:[%s791_s1 + $0x220] sm:$0xff]  ;;  %v87_v22 = vld [vmem:[%s791_s1 + $0x258] sm:$0xff]  ;;  %v93_v23 = vld [vmem:[%s791_s1 + $0x288] sm:$0xff]  ;;  %v425_v25 = vpack.c.bf16 %v23_v18, %v17_v16 }
  0x15   :  { %380 = vmatpush1.bf16.msra.mxu0 %v379_v48  ;;  %v16_v26 = vld [vmem:[%s791_s1 + $0x20] sm:$0xff]  ;;  %v22_v27 = vld [vmem:[%s791_s1 + $0x50] sm:$0xff]  ;;  %v29_v28 = vld [vmem:[%s791_s1 + $0x88] sm:$0xff]  ;;  %v415_v29 = vpack.c.bf16 %v80_v21, %v74_v20  ;;  %v417_v31 = vpack.c.bf16 %v93_v23, %v87_v22 }
  0x16   :  { %382 = vmatprep.subr.bf16.mxu0 %v381_v52  ;;  %v35_v30 = vld [vmem:[%s791_s1 + $0xb8] sm:$0xff]  ;;  %v86_v32 = vld [vmem:[%s791_s1 + $0x250] sm:$0xff]  ;;  %v92_v33 = vld [vmem:[%s791_s1 + $0x280] sm:$0xff]  ;;  %v427_v37 = vpack.c.bf16 %v22_v27, %v16_v26 }
  0x17   :  { %408 = vmatpush1.bf16.msra.mxu1 %v407_v5  ;;  %v99_v34 = vld [vmem:[%s791_s1 + $0x2b8] sm:$0xff]  ;;  %v105_v35 = vld [vmem:[%s791_s1 + $0x2e8] sm:$0xff]  ;;  %v683_v36 = vld [vmem:[%s792_s0] sm:$0xff]  ;;  %v429_v38 = vpack.c.bf16 %v35_v30, %v29_v28  ;;  %v419_v42 = vpack.c.bf16 %v92_v33, %v86_v32 }
  0x18   :  { %410 = vmatprep.subr.bf16.mxu1 %v409_v7  ;;  %v28_v39 = vld [vmem:[%s791_s1 + $0x80] sm:$0xff]  ;;  %v34_v40 = vld [vmem:[%s791_s1 + $0xb0] sm:$0xff]  ;;  %v41_v41 = vld [vmem:[%s791_s1 + $0xe8] sm:$0xff]  ;;  %v421_v44 = vpack.c.bf16 %v105_v35, %v99_v34 }
  0x19   :  { %384 = vmatpush1.bf16.msra.mxu0 %v383_v62  ;;  %v47_v43 = vld [vmem:[%s791_s1 + $0x118] sm:$0xff]  ;;  %v98_v45 = vld [vmem:[%s791_s1 + $0x2b0] sm:$0xff]  ;;  %v104_v46 = vld [vmem:[%s791_s1 + $0x2e0] sm:$0xff]  ;;  %v431_v47 = vpack.c.bf16 %v34_v40, %v28_v39 }
  0x1a   :  { %386 = vmatprep.subr.bf16.mxu0 %v385_v0  ;;  %v433_v48 = vpack.c.bf16 %v47_v43, %v41_v41  ;;  %v40_v49 = vld [vmem:[%s791_s1 + $0xe0] sm:$0xff]  ;;  %v46_v50 = vld [vmem:[%s791_s1 + $0x110] sm:$0xff]  ;;  %v423_v51 = vpack.c.bf16 %v104_v46, %v98_v45  ;;  %v53_v52 = vld [vmem:[%s791_s1 + $0x148] sm:$0xff] }
  0x1b   :  { %412 = vmatpush1.bf16.msra.mxu1 %v411_v17  ;;  %v435_v53 = vpack.c.bf16 %v46_v50, %v40_v49  ;;  %v52_v55 = vld [vmem:[%s791_s1 + $0x140] sm:$0xff]  ;;  %v58_v56 = vld [vmem:[%s791_s1 + $0x170] sm:$0xff]  ;;  %v65_v57 = vld [vmem:[%s791_s1 + $0x1a8] sm:$0xff] }
  0x1c   :  { %414 = vmatprep.subr.bf16.mxu1 %v413_v19  ;;  %v71_v58 = vld [vmem:[%s791_s1 + $0x1d8] sm:$0xff]  ;;  %v439_v59 = vpack.c.bf16 %v58_v56, %v52_v55  ;;  %v64_v61 = vld [vmem:[%s791_s1 + $0x1a0] sm:$0xff]  ;;  %v70_v62 = vld [vmem:[%s791_s1 + $0x1d0] sm:$0xff] }
  0x1d   :  { %388 = vmatpush1.bf16.msra.mxu0 %v387_v12  ;;  %v441_v60 = vpack.c.bf16 %v71_v58, %v65_v57  ;;  %v77_v63 = vld [vmem:[%s791_s1 + $0x208] sm:$0xff]  ;;  %v83_v0 = vld [vmem:[%s791_s1 + $0x238] sm:$0xff]  ;;  %v443_v1 = vpack.c.bf16 %v70_v62, %v64_v61  ;;  %v76_v4 = vld [vmem:[%s791_s1 + $0x200] sm:$0xff] }
  0x1e   :  { %390 = vmatprep.subr.bf16.mxu0 %v389_v13  ;;  %v445_v2 = vpack.c.bf16 %v83_v0, %v77_v63  ;;  %v82_v5 = vld [vmem:[%s791_s1 + $0x230] sm:$0xff]  ;;  %v89_v6 = vld [vmem:[%s791_s1 + $0x268] sm:$0xff]  ;;  %v95_v7 = vld [vmem:[%s791_s1 + $0x298] sm:$0xff] }
  0x1f   :  { %416 = vmatpush1.bf16.msra.mxu1 %v415_v29  ;;  %v447_v8 = vpack.c.bf16 %v82_v5, %v76_v4  ;;  %v449_v9 = vpack.c.bf16 %v95_v7, %v89_v6  ;;  %v88_v10 = vld [vmem:[%s791_s1 + $0x260] sm:$0xff]  ;;  %v94_v11 = vld [vmem:[%s791_s1 + $0x290] sm:$0xff]  ;;  %v101_v12 = vld [vmem:[%s791_s1 + $0x2c8] sm:$0xff] }
  0x20   :  { %418 = vmatprep.subr.bf16.mxu1 %v417_v31  ;;  %v107_v13 = vld [vmem:[%s791_s1 + $0x2f8] sm:$0xff]  ;;  %v451_v14 = vpack.c.bf16 %v94_v11, %v88_v10  ;;  %v100_v16 = vld [vmem:[%s791_s1 + $0x2c0] sm:$0xff]  ;;  %v106_v17 = vld [vmem:[%s791_s1 + $0x2f0] sm:$0xff] }
  0x21   :  { %392 = vmatpush1.bf16.msra.mxu0 %v391_v24  ;;  %v453_v15 = vpack.c.bf16 %v107_v13, %v101_v12  ;;  %v455_v18 = vpack.c.bf16 %v106_v17, %v100_v16 }
  0x22   :  { %426 = vmatprep.subr.bf16.mxu0 %v425_v25 }
  0x23   :  { %420 = vmatpush1.bf16.msra.mxu1 %v419_v42 }
  0x24   :  { %173 = vmatmul.mubr.f32.vlgmr.msra.gmra.mrb[0].mxu0 %v683_v36  ;;  %422 = vmatprep.subr.bf16.mxu1 %v421_v44 }
  0x25   :  { %428 = vmatpush1.bf16.msra.mxu0 %v427_v37  ;;  %314 = vmatprep.mubr.f32.mxu0 %v458_v3  ;;  %v59_v3 = vld [vmem:[%s791_s1 + $0x178] sm:$0xff] }
  0x26   :  { %430 = vmatprep.subr.bf16.mxu0 %v429_v38  ;;  %v437_v54 = vpack.c.bf16 %v59_v3, %v53_v52 }
  0x27   :  { %424 = vmatpush1.bf16.msra.mxu1 %v423_v51 }
  0x29   :  { %432 = vmatpush1.bf16.msra.mxu0 %v431_v47 }
  0x2a   :  { %434 = vmatprep.subr.bf16.mxu0 %v433_v48  ;;  %244 = vmatmul.mubr.f32.vlgmr.msra.gmra.mrb[0].mxu1 %v683_v36 }
  0x2d   :  { %436 = vmatpush1.bf16.msra.mxu0 %v435_v53 }
  0x2e   :  { %438 = vmatprep.subr.bf16.mxu0 %v437_v54 }
  0x31   :  { %440 = vmatpush1.bf16.msra.mxu0 %v439_v59 }
  0x32   :  { %442 = vmatprep.subr.bf16.mxu0 %v441_v60 }
  0x35   :  { %444 = vmatpush1.bf16.msra.mxu0 %v443_v1 }
  0x36   :  { %446 = vmatprep.subr.bf16.mxu0 %v445_v2 }
  0x39   :  { %448 = vmatpush1.bf16.msra.mxu0 %v447_v8 }
  0x3a   :  { %450 = vmatprep.subr.bf16.mxu0 %v449_v9 }
  0x3d   :  { %452 = vmatpush1.bf16.msra.mxu0 %v451_v14 }
  0x3e   :  { %454 = vmatprep.subr.bf16.mxu0 %v453_v15 }
  0x41   :  { %456 = vmatpush1.bf16.msra.mxu0 %v455_v18 }
  0x44   :  { %315 = vmatmul.mubr.f32.vlgmr.msra.gmra.mrb[2].mxu0 %v683_v36 }
  0xf7   :  { %v174_v19 = vpop.f32.mrb[0].mxu0 }
  0xf8   :  { %v321_v20 = vadd.f32 3.0, %v174_v19  ;;  %v176_v21 = vpop.f32.mrb[1].mxu0 }
  0xf9   :  { %v322_v22 = vadd.f32 3.0, %v176_v21 }
  0xfa   :  { %v327_v23 = vmax.f32 %v321_v20, 0.0 }
  0xfb   :  { %v328_v24 = vmax.f32 %v322_v22, 0.0 }
  0xfc   :  { %v333_v25 = vmin.f32 %v327_v23, 6.0 }
  0xfd   :  { %v334_v26 = vmin.f32 %v328_v24, 6.0  ;;  %v245_v30 = vpop.f32.mrb[0].mxu1 }
  0xfe   :  { %v339_v27 = vmul.f32 %v333_v25, %v174_v19  ;;  %v323_v32 = vadd.f32 3.0, %v245_v30  ;;  %v247_v33 = vpop.f32.mrb[1].mxu1 }
  0xff   :  { %v340_v28 = vmul.f32 %v334_v26, %v176_v21  ;;  %v324_v34 = vadd.f32 3.0, %v247_v33 }
 0x100   :  { %v345_v29 = vmul.f32 0.16666667, %v339_v27  ;;  %v329_v35 = vmax.f32 %v323_v32, 0.0 }
 0x101   :  { %v346_v31 = vmul.f32 0.16666667, %v340_v28  ;;  %v330_v36 = vmax.f32 %v324_v34, 0.0 }
 0x102   :  { %351 = vst [vmem:[%s793_s2] sm:$0xff] %v345_v29  ;;  %v335_v37 = vmin.f32 %v329_v35, 6.0 }
 0x103   :  { %352 = vst [vmem:[%s793_s2 + $0x8] sm:$0xff] %v346_v31  ;;  %v336_v38 = vmin.f32 %v330_v36, 6.0 }
 0x104   :  { %v341_v39 = vmul.f32 %v335_v37, %v245_v30 }
 0x105   :  { %v342_v40 = vmul.f32 %v336_v38, %v247_v33 }
 0x106   :  { %v347_v41 = vmul.f32 0.16666667, %v341_v39 }
 0x107   :  { %v348_v42 = vmul.f32 0.16666667, %v342_v40 }
 0x108   :  { %353 = vst [vmem:[%s793_s2 + $0x10] sm:$0xff] %v347_v41 }
 0x109   :  { %354 = vst [vmem:[%s793_s2 + $0x18] sm:$0xff] %v348_v42 }
 0x117   :  { %v316_v43 = vpop.f32.mrb[2].mxu0 }
 0x118   :  { %v325_v44 = vadd.f32 3.0, %v316_v43  ;;  %v318_v45 = vpop.f32.mrb[3].mxu0 }
 0x119   :  { %v326_v46 = vadd.f32 3.0, %v318_v45 }
 0x11a   :  { %v331_v47 = vmax.f32 %v325_v44, 0.0 }
 0x11b   :  { %v332_v48 = vmax.f32 %v326_v46, 0.0 }
 0x11c   :  { %v337_v49 = vmin.f32 %v331_v47, 6.0 }
 0x11d   :  { %v338_v50 = vmin.f32 %v332_v48, 6.0 }
 0x11e   :  { %v343_v51 = vmul.f32 %v337_v49, %v316_v43 }
 0x11f   :  { %v344_v52 = vmul.f32 %v338_v50, %v318_v45 }
 0x120   :  { %v349_v3 = vmul.f32 0.16666667, %v343_v51 }
 0x121   :  { %v350_v53 = vmul.f32 0.16666667, %v344_v52 }
 0x122   :  { %355 = vst [vmem:[%s793_s2 + $0x20] sm:$0xff] %v349_v3 }
 0x123   :  { %356 = vst [vmem:[%s793_s2 + $0x28] sm:$0xff] %v350_v53 }

</bundles_post_ra>
